<compile_context>
chip_gen: v5e
topology: v5e:2x2
jax: 0.10.0
libtpu: 0.0.40
codegen_flags: <defaults>
</compile_context>

<pallas_src>
import jax
import jax.numpy as jnp
from jax import lax
from jax.experimental import pallas as pl
from jax.experimental.pallas import tpu as pltpu


def _round_up(x, m):
    return ((x + m - 1) // m) * m


def _medusa_head_kernel(x_ref, w_ref, o_ref):
    # x_ref: (tm, H) token tile; w_ref: (tn, H) vocab tile (contiguous PyTorch
    # [V, H] layout); o_ref: (tm, tn) logits tile (lane-dense, multiple of 128).
    # Contract over the shared H (last) axis on the MXU with f32 accumulation.
    # The transposed-RHS contraction (((1,),(1,))) is the same pattern as
    # q @ k.T in flash attention and uses the MXU transposed-operand path; if a
    # bundle dump ever shows a per-tile XLU weight transpose on a given gen,
    # pre-transpose the weight to [H, V] once at init instead.
    o_ref[...] = lax.dot_general(
        x_ref[...], w_ref[...],
        dimension_numbers=(((1,), (1,)), ((), ())),
        preferred_element_type=jnp.float32,
    ).astype(o_ref.dtype)


def _vmem_cap_bytes():
    """Generation-aware scoped-VMEM cap."""
    try:
        cap = int(getattr(pltpu.get_tpu_info(), "vmem_capacity_bytes", 64 << 20))
    except Exception:  # interpret mode / info unavailable: be conservative.
        cap = 64 << 20
    if cap <= (64 << 20):
        # v7x: 64 MiB VMEM per TensorCore -- leave compiler/internal headroom.
        return 56 << 20
    # v5e/v6e: 128 MiB physical -- go well past the 16/32 MiB scoped default.
    return 96 << 20


def medusa_head_forward(hidden_states, weight, *, tm=256, tn=2048, out_dtype=None):
    """MedusaHead forward: logits = hidden_states @ weight.T (no bias).

    hidden_states: [B, S, H].
    weight:        [V, H] (PyTorch nn.Linear layout). For best performance cast
                   it to bf16 ONCE at init (passing f32 doubles weight HBM
                   traffic and uses the slower f32 MXU path).
    Returns [B, S, V] logits in `out_dtype` (defaults to hidden_states.dtype,
    matching nn.Linear). Activations are cast to the weight dtype once in this
    wrapper (intentional bf16-input deviation from nn.Linear's f32 matmul;
    accumulation stays f32 on the MXU).
    """
    B, S, H = hidden_states.shape
    V, H2 = weight.shape
    assert H == H2, "hidden size mismatch"
    out_dtype = jnp.dtype(out_dtype or hidden_states.dtype)

    M = B * S
    x2d = hidden_states.reshape(M, H)
    # One wrapper-side cast of the (small) activations to the weight dtype, so
    # the kernel never re-converts per vocab tile.
    if x2d.dtype != weight.dtype:
        x2d = x2d.astype(weight.dtype)
    x_itemsize = x2d.dtype.itemsize

    # Clamp tiles for small shapes; keep TPU layout constraints:
    # second-to-last dim multiple of 8, lane dim multiple of 128 (or full dim).
    tm_eff = min(tm, _round_up(M, 8))
    tn_eff = min(tn, _round_up(V, 128))

    vmem_cap = _vmem_cap_bytes()

    def footprint(tm_e, tn_e):
        # Double-buffered x / w / out tiles.
        return (2 * tm_e * H * x_itemsize
                + 2 * tn_e * H * weight.dtype.itemsize
                + 2 * tm_e * tn_e * out_dtype.itemsize)

    # Shrink tiles (vocab first, keeping multiples of 128) until the
    # double-buffered footprint fits the generation's VMEM budget.
    while footprint(tm_eff, tn_eff) + (4 << 20) > vmem_cap and tn_eff > 128:
        tn_eff = max(128, _round_up(tn_eff // 2, 128))
    while footprint(tm_eff, tn_eff) + (4 << 20) > vmem_cap and tm_eff > 8:
        tm_eff = max(8, _round_up(tm_eff // 2, 8))

    num_v_tiles = pl.cdiv(V, tn_eff)
    num_m_tiles = pl.cdiv(M, tm_eff)
    # Vocab axis OUTER (megacore-sharded on v7x for decode), token axis INNER so
    # the weight tile is resident across the token sweep -> V*H read from HBM
    # exactly once; only the activations are re-streamed (V/tn times).
    grid = (num_v_tiles, num_m_tiles)

    vmem_limit = int(min(vmem_cap, max(32 << 20, footprint(tm_eff, tn_eff) + (8 << 20))))

    cost = pl.CostEstimate(
        flops=2 * M * H * V,
        bytes_accessed=(num_v_tiles * M * H * x_itemsize        # x re-streamed per vocab tile
                        + V * H * weight.dtype.itemsize          # weight read once
                        + M * V * out_dtype.itemsize),           # logits writeback
        transcendentals=0,
    )

    out2d = pl.pallas_call(
        _medusa_head_kernel,
        out_shape=jax.ShapeDtypeStruct((M, V), out_dtype),
        grid_spec=pltpu.PrefetchScalarGridSpec(
            num_scalar_prefetch=0,
            grid=grid,
            in_specs=[
                # Token tile: (tm, full H), re-streamed across vocab tiles.
                pl.BlockSpec((tm_eff, H), lambda i, j: (j, 0)),
                # Vocab tile of the contiguous [V, H] weight: constant across
                # the inner token sweep -> fetched from HBM exactly once.
                pl.BlockSpec((tn_eff, H), lambda i, j: (i, 0)),
            ],
            out_specs=pl.BlockSpec((tm_eff, tn_eff), lambda i, j: (j, i)),
        ),
        compiler_params=pltpu.CompilerParams(
            dimension_semantics=("parallel", "parallel"),
            vmem_limit_bytes=vmem_limit,
        ),
        cost_estimate=cost,
    )(x2d, weight)

    return out2d.reshape(B, S, V)


if __name__ == "__main__":
    # Small, deterministic shapes consistent with the module.
    batch, seq, hidden_size, vocab_size = 2, 8, 32, 256

    key = jax.random.PRNGKey(0)
    k_x, k_w = jax.random.split(key)

    hidden_states = jax.random.normal(k_x, (batch, seq, hidden_size), dtype=jnp.float32)
    # nn.Linear weight is [vocab, hidden], init normal(mean=0, std=0.02).
    weight_f32 = 0.02 * jax.random.normal(k_w, (vocab_size, hidden_size), dtype=jnp.float32)
    # One-time, init-level cast to bf16: halves HBM weight traffic for this
    # bandwidth-bound head (done once here, NOT inside the per-call forward).
    weight = weight_f32.astype(jnp.bfloat16)

    logits = jax.block_until_ready(medusa_head_forward(hidden_states, weight))

    # Correctness check vs. plain JAX reference with the same bf16 inputs /
    # f32 accumulation (documented precision deviation from f32 nn.Linear).
    x_ref = hidden_states.astype(jnp.bfloat16).astype(jnp.float32)
    w_ref = weight.astype(jnp.float32)
    ref = jnp.einsum("bsh,vh->bsv", x_ref, w_ref)
    assert logits.shape == (batch, seq, vocab_size)
    assert logits.dtype == hidden_states.dtype
    assert jnp.allclose(logits, ref, atol=1e-3, rtol=1e-3)

    print("KERNEL_OK")
</pallas_src>

<mosaic_0001>
module attributes {stable_mosaic.version = 11 : i64} {
  func.func @_medusa_head_kernel(%arg0: i32, %arg1: i32, %arg2: memref<16x32xbf16, #tpu.memory_space<vmem>>, %arg3: memref<256x32xbf16, #tpu.memory_space<vmem>>, %arg4: memref<16x256xf32, #tpu.memory_space<vmem>>) attributes {dimension_semantics = [#tpu.dimension_semantics<parallel>, #tpu.dimension_semantics<parallel>], iteration_bounds = array<i64: 1, 1>, scalar_prefetch = 0 : i64, scratch_operands = 0 : i64, tpu.core_type = #tpu.core_type<tc>, window_params = [{transform_indices = @transform_0, window_bounds = array<i64: 16, 32>}, {transform_indices = @transform_1, window_bounds = array<i64: 256, 32>}, {transform_indices = @transform_2, window_bounds = array<i64: 16, 256>}]} {
    %c0 = arith.constant 0 : index
    %c0_0 = arith.constant 0 : index
    %0 = vector.load %arg2[%c0, %c0_0] : memref<16x32xbf16, #tpu.memory_space<vmem>>, vector<16x32xbf16>
    %c0_1 = arith.constant 0 : index
    %c0_2 = arith.constant 0 : index
    %1 = vector.load %arg3[%c0_1, %c0_2] : memref<256x32xbf16, #tpu.memory_space<vmem>>, vector<256x32xbf16>
    %cst = arith.constant dense<0.000000e+00> : vector<16x256xf32>
    %2 = tpu.matmul %0, %1, %cst {dimension_numbers = #tpu.dot_dimension_numbers<[1], [1], [0], [0], [0, 0, 1, 0], [], []>} : vector<16x32xbf16>, vector<256x32xbf16>, vector<16x256xf32> -> vector<16x256xf32>
    %c0_3 = arith.constant 0 : index
    %c0_4 = arith.constant 0 : index
    %3 = vector.load %arg4[%c0_3, %c0_4] : memref<16x256xf32, #tpu.memory_space<vmem>>, vector<16x256xf32>
    tpu.vector_store %arg4[%c0_3, %c0_4], %2 {strides = array<i32>} : memref<16x256xf32, #tpu.memory_space<vmem>>, vector<16x256xf32>,
    return
  }
  func.func @transform_0(%arg0: i32, %arg1: i32) -> (i32, i32) {
    %c0_i32 = arith.constant 0 : i32
    %c0_i32_0 = arith.constant 0 : i32
    return %arg1, %c0_i32 : i32, i32
  }
  func.func @transform_1(%arg0: i32, %arg1: i32) -> (i32, i32) {
    %c0_i32 = arith.constant 0 : i32
    %c0_i32_0 = arith.constant 0 : i32
    return %arg0, %c0_i32 : i32, i32
  }
  func.func @transform_2(%arg0: i32, %arg1: i32) -> (i32, i32) {
    %c0_i32 = arith.constant 0 : i32
    return %arg1, %arg0 : i32, i32
  }
}

</mosaic_0001>

<bundles_post_ra>
// kernel: tpu_custom_call.1
= control target key start
LH: loop header
LB: loop body
LE: loop exit
PB: predicated region body
PF: predicated region fallthrough
CT: control target
= control target key end

     0   :  { %vm131_vm0 = vcmask 261120   ;;  %s439_s0 = inlined_call_operand.vmem [shape: bf16[16,32], index: 0, kind: input, shape index: {}]   ;;  %s440_s1 = inlined_call_operand.vmem [shape: bf16[256,32], index: 1, kind: input, shape index: {}]   ;;  %s441_s2 = inlined_call_operand.hbm [shape: f32[16,256], index: 2, kind: output, shape index: {}]  }
   0x1   :  { %v311_v0 = vld [vmem:[%s440_s1 + $0x38] sm:$0xff]  ;;  %v310_v4 = vld [vmem:[%s440_s1 + $0x30] sm:$0xff] }
   0x2   :  { %v319_v1 = vld [vmem:[%s440_s1 + $0x78] sm:$0xff]  ;;  %v157_v2 = vsel %vm131_vm0, %v311_v0, 0  ;;  %v318_v5 = vld [vmem:[%s440_s1 + $0x70] sm:$0xff] }
   0x3   :  { %v181_v3 = vsel %vm131_vm0, %v319_v1, 0  ;;  %183 = vmatpush.bf16.xpose.msra.mxu0 %v157_v2 }
   0x4   :  { %197 = vmatpush.bf16.xpose.msra.mxu1 %v181_v3 }
   0x5   :  { %7 = vsyncpa [#allocation3], 0  ;;  %v154_v6 = vsel %vm131_vm0, %v310_v4, 0  ;;  %v178_v7 = vsel %vm131_vm0, %v318_v5, 0  ;;  %v309_v8 = vld [vmem:[%s440_s1 + $0x28] sm:$0xff]  ;;  %v308_v12 = vld [vmem:[%s440_s1 + $0x20] sm:$0xff] }
   0x6   :  { %v317_v9 = vld [vmem:[%s440_s1 + $0x68] sm:$0xff]  ;;  %v151_v10 = vsel %vm131_vm0, %v309_v8, 0  ;;  %v316_v13 = vld [vmem:[%s440_s1 + $0x60] sm:$0xff]  ;;  %v148_v14 = vsel %vm131_vm0, %v308_v12, 0  ;;  %v307_v16 = vld [vmem:[%s440_s1 + $0x18] sm:$0xff]  ;;  %s349_s15 = smov [#allocation2]  }
   0x7   :  { %v175_v11 = vsel %vm131_vm0, %v317_v9, 0  ;;  %v172_v15 = vsel %vm131_vm0, %v316_v13, 0  ;;  %v315_v17 = vld [vmem:[%s440_s1 + $0x58] sm:$0xff]  ;;  %v145_v18 = vsel %vm131_vm0, %v307_v16, 0  ;;  %v306_v20 = vld [vmem:[%s440_s1 + $0x10] sm:$0xff]  ;;  %v305_v24 = vld [vmem:[%s440_s1 + $0x8] sm:$0xff] }
   0x8   :  { %v169_v19 = vsel %vm131_vm0, %v315_v17, 0  ;;  %v314_v21 = vld [vmem:[%s440_s1 + $0x50] sm:$0xff]  ;;  %v142_v22 = vsel %vm131_vm0, %v306_v20, 0  ;;  %v313_v25 = vld [vmem:[%s440_s1 + $0x48] sm:$0xff]  ;;  %v139_v26 = vsel %vm131_vm0, %v305_v24, 0  ;;  %v304_v28 = vld [vmem:[%s440_s1] sm:$0xff] }
   0x9   :  { %v166_v23 = vsel %vm131_vm0, %v314_v21, 0  ;;  %v163_v27 = vsel %vm131_vm0, %v313_v25, 0  ;;  %v312_v29 = vld [vmem:[%s440_s1 + $0x40] sm:$0xff]  ;;  %v136_v30 = vsel %vm131_vm0, %v304_v28, 0  ;;  %s219_s1 = sshll.u32 %s349_s15, 4  ;;  %s221_s18 = sshll.u32 %s441_s2, 4  ;;  %s220_s1 = int_to_ptr.vmem [resolvable:$true] %s219_s1  ;;  %s222_s18 = int_to_ptr.hbm [resolvable:$true] %s221_s18 }
   0xa   :  { %v160_v31 = vsel %vm131_vm0, %v312_v29, 0  ;;  %v303_v32 = vld [vmem:[%s439_s0] sm:$0xff]  ;;  %s350_s0 = smov 256   ;;  %s351_s19 = smov 16  }
   0xb   :  { %184 = vmatpush.bf16.xpose.msra.mxu0 %v154_v6 }
   0xc   :  { %198 = vmatpush.bf16.xpose.msra.mxu1 %v178_v7 }
  0x13   :  { %185 = vmatpush.bf16.xpose.msra.mxu0 %v151_v10 }
  0x14   :  { %199 = vmatpush.bf16.xpose.msra.mxu1 %v175_v11 }
  0x1b   :  { %186 = vmatpush.bf16.xpose.msra.mxu0 %v148_v14 }
  0x1c   :  { %200 = vmatpush.bf16.xpose.msra.mxu1 %v172_v15 }
  0x23   :  { %187 = vmatpush.bf16.xpose.msra.mxu0 %v145_v18 }
  0x24   :  { %201 = vmatpush.bf16.xpose.msra.mxu1 %v169_v19 }
  0x2b   :  { %188 = vmatpush.bf16.xpose.msra.mxu0 %v142_v22 }
  0x2c   :  { %202 = vmatpush.bf16.xpose.msra.mxu1 %v166_v23 }
  0x33   :  { %189 = vmatpush.bf16.xpose.msra.mxu0 %v139_v26 }
  0x34   :  { %203 = vmatpush.bf16.xpose.msra.mxu1 %v163_v27 }
  0x3b   :  { %190 = vmatpush.bf16.xpose.msra.mxu0 %v136_v30 }
  0x3c   :  { %204 = vmatpush.bf16.xpose.msra.mxu1 %v160_v31 }
  0x42   :  { %301 = vmatmul.msk.bf16.vlgmr.msra.gmra.mxu0 %vm131_vm0, %v303_v32 }
  0x43   :  { %302 = vmatmul.msk.bf16.vlgmr.msra.gmra.mxu1 %vm131_vm0, %v303_v32 }
  0xbf   :  { %v192_v33 = vpop.f32.mrf.mxu0 }
  0xc0   :  { %v206_v34 = vpop.f32.mrf.mxu1  ;;  %211 = vst [vmem:[#allocation2] sm:$0xff] %v192_v33 }
  0xc1   :  { %212 = vst [vmem:[#allocation2 + $0x8] sm:$0xff] %v206_v34 }
  0xc7   :  { %v194_v35 = vpop.f32.mrf.mxu0 }
  0xc8   :  { %v208_v36 = vpop.f32.mrf.mxu1  ;;  %213 = vst [vmem:[#allocation2 + $0x10] sm:$0xff] %v194_v35 }
  0xc9   :  { %214 = vst [vmem:[#allocation2 + $0x18] sm:$0xff] %v208_v36 }
  0xca   :  { %227 = dma.vmem_to_hbm [thread:$0]  %s220_s1, 512, %s222_s18, [#allocation3], %s350_s0, %s350_s0, %s351_s19  }
  0xcb   :  { %347 = dma.done.wait [#allocation3], 512  }
  0xcc   :  { %348 = vsyncadd [#allocation3], 4294966784 }
  0xcd   :  { %232 = vsyncpa [#allocation3], 1 }

</bundles_post_ra>
